<compile_context>
chip_gen: v6e
topology: v6e:2x2x1
jax: 0.10.0
libtpu: 0.0.40
codegen_flags: <defaults>
</compile_context>

<pallas_src>
import functools

import jax
import jax.numpy as jnp
from jax import lax
from jax.experimental import pallas as pl
from jax.experimental.pallas import tpu as pltpu


# ----------------------------- Pallas kernels ------------------------------ #

def _matmul_bias_kernel(x_ref, w_ref, b_ref, o_ref, *, relu):
    # o = act(W @ X + b)   with W:(Cout,K), X:(K,tm), b:(Cout,1)
    acc = jnp.dot(w_ref[...], x_ref[...], preferred_element_type=jnp.float32)
    out = acc + b_ref[...]
    if relu:
        out = jnp.maximum(out, 0.0)
    o_ref[...] = out.astype(o_ref.dtype)


def _dual_matmul_bias_relu_kernel(x1_ref, w1_ref, b1_ref,
                                  x2_ref, w2_ref, b2_ref, o_ref):
    # o = relu(W1 @ X1 + b1 + W2 @ X2 + b2)  -- conv3+bn3 fused with
    # downsample+bn_d, residual add and final ReLU in one output tile.
    a1 = jnp.dot(w1_ref[...], x1_ref[...], preferred_element_type=jnp.float32)
    a2 = jnp.dot(w2_ref[...], x2_ref[...], preferred_element_type=jnp.float32)
    out = a1 + b1_ref[...] + a2 + b2_ref[...]
    o_ref[...] = jnp.maximum(out, 0.0).astype(o_ref.dtype)


# ------------------------------ call wrappers ------------------------------ #

def _choose_tm(m, target=512):
    """Fixed large 128-aligned tile (grid via cdiv); >=2 grid steps when possible
    so the 'parallel' axis can shard across v7x's two TensorCores."""
    if m <= 128:
        return m
    half = (m // 2) // 128 * 128
    if half == 0:
        return m                      # 128 < m < 256: single full-extent block
    return max(128, min(target, half))


def _vmem_limit_bytes(block_bytes):
    need = 2 * block_bytes            # double-buffered pipeline
    return int(min(100 * 2**20, max(32 * 2**20, 2 * need)))


def matmul_bias(xT, w_ck, bias_c, *, relu, tm_target=512):
    """(Cout, M) = act(w_ck @ xT + bias),  xT:(K, M), w_ck:(Cout, K)."""
    K, M = xT.shape
    Cout, Kw = w_ck.shape
    assert K == Kw
    tm = _choose_tm(M, tm_target)
    grid = (pl.cdiv(M, tm),)
    b2 = bias_c.reshape(Cout, 1).astype(jnp.float32)
    blk = 4 * (K * tm + Cout * K + Cout + Cout * tm)
    return pl.pallas_call(
        functools.partial(_matmul_bias_kernel, relu=relu),
        out_shape=jax.ShapeDtypeStruct((Cout, M), xT.dtype),
        grid=grid,
        in_specs=[
            pl.BlockSpec((K, tm), lambda i: (0, i)),
            pl.BlockSpec((Cout, K), lambda i: (0, 0)),
            pl.BlockSpec((Cout, 1), lambda i: (0, 0)),
        ],
        out_specs=pl.BlockSpec((Cout, tm), lambda i: (0, i)),
        compiler_params=pltpu.CompilerParams(
            dimension_semantics=("parallel",),
            vmem_limit_bytes=_vmem_limit_bytes(blk)),
    )(xT, w_ck, b2)


def dual_matmul_bias_relu(x1T, w1_ck, b1_c, x2T, w2_ck, b2_c, *, tm_target=512):
    """(Cout, M) = relu(w1 @ x1 + b1 + w2 @ x2 + b2)  (fused conv3 + downsample)."""
    k1, M = x1T.shape
    k2, M2 = x2T.shape
    assert M == M2
    Cout = w1_ck.shape[0]
    assert w2_ck.shape[0] == Cout and w1_ck.shape[1] == k1 and w2_ck.shape[1] == k2
    tm = _choose_tm(M, tm_target)
    grid = (pl.cdiv(M, tm),)
    b1 = b1_c.reshape(Cout, 1).astype(jnp.float32)
    b2 = b2_c.reshape(Cout, 1).astype(jnp.float32)
    blk = 4 * (k1 * tm + k2 * tm + Cout * (k1 + k2 + 2) + Cout * tm)
    return pl.pallas_call(
        _dual_matmul_bias_relu_kernel,
        out_shape=jax.ShapeDtypeStruct((Cout, M), x1T.dtype),
        grid=grid,
        in_specs=[
            pl.BlockSpec((k1, tm), lambda i: (0, i)),
            pl.BlockSpec((Cout, k1), lambda i: (0, 0)),
            pl.BlockSpec((Cout, 1), lambda i: (0, 0)),
            pl.BlockSpec((k2, tm), lambda i: (0, i)),
            pl.BlockSpec((Cout, k2), lambda i: (0, 0)),
            pl.BlockSpec((Cout, 1), lambda i: (0, 0)),
        ],
        out_specs=pl.BlockSpec((Cout, tm), lambda i: (0, i)),
        compiler_params=pltpu.CompilerParams(
            dimension_semantics=("parallel",),
            vmem_limit_bytes=_vmem_limit_bytes(blk)),
    )(x1T, w1_ck, b1, x2T, w2_ck, b2)


# ------------------------------ JAX glue ----------------------------------- #

def _fold_bn(gamma, beta, mean, var, eps=1e-5):
    scale = gamma / jnp.sqrt(var + eps)
    bias = beta - mean * scale
    return scale, bias


# --------------------------- Bottleneck3d module --------------------------- #

def make_params(key, inplanes=8, planes=4, stride=2):
    """Deterministic synthetic parameters (2D weights, inflated like inflate_conv)."""
    expansion = 4
    keys = list(jax.random.split(key, 24))   # 4 conv weights + 4 BN * 4 params = 20
    k = iter(keys)

    def conv_w(shape):
        return 0.1 * jax.random.normal(next(k), shape, dtype=jnp.float32)

    def bn_p(c):
        return dict(
            gamma=1.0 + 0.1 * jax.random.normal(next(k), (c,), dtype=jnp.float32),
            beta=0.1 * jax.random.normal(next(k), (c,), dtype=jnp.float32),
            mean=0.05 * jax.random.normal(next(k), (c,), dtype=jnp.float32),
            var=jnp.abs(1.0 + 0.1 * jax.random.normal(next(k), (c,), dtype=jnp.float32)),
        )

    # 2D weights (as in the original 2D bottleneck), inflated with center=True.
    w1_2d = conv_w((planes, inplanes, 1, 1))
    w2_2d = conv_w((planes, planes, 3, 3))
    w3_2d = conv_w((planes * expansion, planes, 1, 1))
    wd_2d = conv_w((planes * expansion, inplanes, 1, 1))

    w1 = w1_2d[:, :, None, :, :]                               # time_dim=1
    w2 = jnp.zeros((planes, planes, 3, 3, 3), jnp.float32)     # time_dim=3, center
    w2 = w2.at[:, :, 1, :, :].set(w2_2d)
    w3 = w3_2d[:, :, None, :, :]                               # time_dim=1
    wd = wd_2d[:, :, None, :, :]                               # time_dim=1

    return dict(
        stride=stride,
        w1=w1, bn1=bn_p(planes),
        w2=w2, bn2=bn_p(planes),
        w3=w3, bn3=bn_p(planes * expansion),
        wd=wd, bnd=bn_p(planes * expansion),
    )


def bottleneck3d_forward(params, x):
    """x: (N, Cin, T, H, W) float32 -> (N, 4*planes, T', H', W')."""
    s = int(params["stride"])
    n, cin, t, h, w = x.shape

    # ---- conv1 (1x1x1) + bn1 + relu :  o1 = relu(W1' @ X + b1)
    w1 = params["w1"]
    cmid = w1.shape[0]
    sc1, b1 = _fold_bn(**params["bn1"])
    w1f = w1.reshape(cmid, cin) * sc1[:, None]          # BN scale folded into rows
    xT = jnp.transpose(x, (1, 0, 2, 3, 4)).reshape(cin, n * t * h * w)
    o1T = matmul_bias(xT, w1f, b1, relu=True)           # (cmid, N*T*H*W)

    # ---- conv2 (3x3x3, stride s, pad 1) + bn2 + relu
    w2 = params["w2"]
    sc2, b2 = _fold_bn(**params["bn2"])
    to = (t + 2 - 3) // s + 1
    ho = (h + 2 - 3) // s + 1
    wo = (w + 2 - 3) // s + 1
    m2 = n * to * ho * wo

    # Inflated (center=True) weights are exactly zero off the center temporal
    # slice; skip those taps (27 -> 9 taps). Falls back to all 3 slices if the
    # weights are not concrete or not sparse, so semantics are always preserved.
    try:
        active_kt = [kt for kt in range(3)
                     if bool(jnp.any(w2[:, :, kt, :, :] != 0))]
    except Exception:
        active_kt = [0, 1, 2]
    if not active_kt:
        active_kt = [1]

    o1 = o1T.reshape(cmid, n, t, h, w)
    o1p = jnp.pad(o1, ((0, 0), (0, 0), (1, 1), (1, 1), (1, 1)))
    taps = []
    for kt in active_kt:
        for kh in range(3):
            for kw in range(3):
                taps.append(o1p[:, :,
                                kt:kt + (to - 1) * s + 1:s,
                                kh:kh + (ho - 1) * s + 1:s,
                                kw:kw + (wo - 1) * s + 1:s])
    # (cmid, n_taps, N, To, Ho, Wo) -> (cmid*n_taps, M2); built at OUTPUT
    # (post-stride) resolution, so the gather is small even for stride 2.
    cols = jnp.stack(taps, axis=1).reshape(cmid * len(taps), m2)
    # TODO(synk): for production shapes, accumulate the 9 taps inside the kernel
    # (reduction grid axis + VMEM accumulator) so `cols` never hits HBM.
    w2_sel = w2[:, :, jnp.asarray(active_kt), :, :]      # (cmid, cmid, nkt, 3, 3)
    w2f = w2_sel.reshape(cmid, cmid * len(active_kt) * 9) * sc2[:, None]
    o2T = matmul_bias(cols, w2f, b2, relu=True)          # (cmid, M2)

    # ---- conv3 + bn3 fused with downsample(1x1x1, stride s) + bn_d + add + relu
    w3 = params["w3"]
    wd = params["wd"]
    cout = w3.shape[0]
    sc3, b3 = _fold_bn(**params["bn3"])
    scd, bd = _fold_bn(**params["bnd"])
    w3f = w3.reshape(cout, cmid) * sc3[:, None]
    wdf = wd.reshape(cout, cin) * scd[:, None]
    xdT = jnp.transpose(x[:, :, ::s, ::s, ::s],
                        (1, 0, 2, 3, 4)).reshape(cin, m2)
    o3T = dual_matmul_bias_relu(o2T, w3f, b3, xdT, wdf, bd)   # (cout, M2)

    return jnp.transpose(o3T.reshape(cout, n, to, ho, wo), (1, 0, 2, 3, 4))


# ------------------------------- Reference --------------------------------- #

def _ref_conv3d(x, w, stride, padding):
    return lax.conv_general_dilated(
        x, w, window_strides=(stride,) * 3,
        padding=[(padding, padding)] * 3,
        dimension_numbers=("NCDHW", "OIDHW", "NCDHW"))


def _ref_bn(x, p, eps=1e-5):
    sh = (1, -1, 1, 1, 1)
    return (x - p["mean"].reshape(sh)) / jnp.sqrt(p["var"].reshape(sh) + eps) \
        * p["gamma"].reshape(sh) + p["beta"].reshape(sh)


def bottleneck3d_reference(params, x):
    s = int(params["stride"])
    out = jnp.maximum(_ref_bn(_ref_conv3d(x, params["w1"], 1, 0), params["bn1"]), 0.0)
    out = jnp.maximum(_ref_bn(_ref_conv3d(out, params["w2"], s, 1), params["bn2"]), 0.0)
    out = _ref_bn(_ref_conv3d(out, params["w3"], 1, 0), params["bn3"])
    res = _ref_bn(_ref_conv3d(x, params["wd"], s, 0), params["bnd"])
    return jnp.maximum(out + res, 0.0)


# --------------------------------- Main ------------------------------------ #

if __name__ == "__main__":
    key = jax.random.PRNGKey(0)
    pkey, xkey = jax.random.split(key)

    # small shapes: batch=2, inplanes=8, planes=4 (expansion 4 -> 16 out), T=4, H=W=16
    params = make_params(pkey, inplanes=8, planes=4, stride=2)
    x = jax.random.normal(xkey, (2, 8, 4, 16, 16), dtype=jnp.float32)

    fwd = jax.jit(functools.partial(bottleneck3d_forward, params))
    out = jax.block_until_ready(fwd(x))

    ref = jax.block_until_ready(bottleneck3d_reference(params, x))
    assert out.shape == ref.shape == (2, 16, 2, 8, 8), (out.shape, ref.shape)
    err = float(jnp.max(jnp.abs(out - ref)))
    assert jnp.allclose(out, ref, atol=1e-4, rtol=1e-4), err

    print("KERNEL_OK")
</pallas_src>

<mosaic_0001>
module attributes {stable_mosaic.version = 11 : i64} {
  func.func @_matmul_bias_kernel(%arg0: i32, %arg1: memref<8x512xf32, #tpu.memory_space<vmem>>, %arg2: memref<4x8xf32, #tpu.memory_space<vmem>>, %arg3: memref<4x1xf32, #tpu.memory_space<vmem>>, %arg4: memref<4x512xf32, #tpu.memory_space<vmem>>) attributes {dimension_semantics = [#tpu.dimension_semantics<parallel>], iteration_bounds = array<i64: 4>, scalar_prefetch = 0 : i64, scratch_operands = 0 : i64, tpu.core_type = #tpu.core_type<tc>, window_params = [{transform_indices = @transform_0, window_bounds = array<i64: 8, 512>}, {pipeline_mode = #tpu.pipeline_mode<synchronous>, transform_indices = @transform_1, window_bounds = array<i64: 4, 8>}, {pipeline_mode = #tpu.pipeline_mode<synchronous>, transform_indices = @transform_2, window_bounds = array<i64: 4, 1>}, {transform_indices = @transform_3, window_bounds = array<i64: 4, 512>}]} {
    %c0 = arith.constant 0 : index
    %c0_0 = arith.constant 0 : index
    %0 = vector.load %arg2[%c0, %c0_0] : memref<4x8xf32, #tpu.memory_space<vmem>>, vector<4x8xf32>
    %c0_1 = arith.constant 0 : index
    %c0_2 = arith.constant 0 : index
    %1 = vector.load %arg1[%c0_1, %c0_2] : memref<8x512xf32, #tpu.memory_space<vmem>>, vector<8x512xf32>
    %cst = arith.constant dense<0.000000e+00> : vector<4x512xf32>
    %2 = tpu.matmul %0, %1, %cst {dimension_numbers = #tpu.dot_dimension_numbers<[1], [0], [0], [1], [0, 0, 1, 1], [], []>} : vector<4x8xf32>, vector<8x512xf32>, vector<4x512xf32> -> vector<4x512xf32>
    %c0_3 = arith.constant 0 : index
    %c0_4 = arith.constant 0 : index
    %3 = vector.load %arg3[%c0_3, %c0_4] : memref<4x1xf32, #tpu.memory_space<vmem>>, vector<4x1xf32>
    %4 = vector.broadcast %3 : vector<4x1xf32> to vector<4x512xf32>
    %5 = arith.addf %2, %4 : vector<4x512xf32>
    %cst_5 = arith.constant 0.000000e+00 : f32
    %6 = vector.broadcast %cst_5 : f32 to vector<4x512xf32>
    %7 = arith.maximumf %5, %6 : vector<4x512xf32>
    %c0_6 = arith.constant 0 : index
    %c0_7 = arith.constant 0 : index
    %8 = vector.load %arg4[%c0_6, %c0_7] : memref<4x512xf32, #tpu.memory_space<vmem>>, vector<4x512xf32>
    tpu.vector_store %arg4[%c0_6, %c0_7], %7 {strides = array<i32>} : memref<4x512xf32, #tpu.memory_space<vmem>>, vector<4x512xf32>,
    return
  }
  func.func @transform_0(%arg0: i32) -> (i32, i32) {
    %c0_i32 = arith.constant 0 : i32
    %c0_i32_0 = arith.constant 0 : i32
    return %c0_i32, %arg0 : i32, i32
  }
  func.func @transform_1(%arg0: i32) -> (i32, i32) {
    %c0_i32 = arith.constant 0 : i32
    %c0_i32_0 = arith.constant 0 : i32
    %c0_i32_1 = arith.constant 0 : i32
    return %c0_i32, %c0_i32_0 : i32, i32
  }
  func.func @transform_2(%arg0: i32) -> (i32, i32) {
    %c0_i32 = arith.constant 0 : i32
    %c0_i32_0 = arith.constant 0 : i32
    %c0_i32_1 = arith.constant 0 : i32
    return %c0_i32, %c0_i32_0 : i32, i32
  }
  func.func @transform_3(%arg0: i32) -> (i32, i32) {
    %c0_i32 = arith.constant 0 : i32
    %c0_i32_0 = arith.constant 0 : i32
    return %c0_i32, %arg0 : i32, i32
  }
}

module attributes {stable_mosaic.version = 11 : i64} {
  func.func @_matmul_bias_kernel(%arg0: i32, %arg1: memref<108x128xf32, #tpu.memory_space<vmem>>, %arg2: memref<4x108xf32, #tpu.memory_space<vmem>>, %arg3: memref<4x1xf32, #tpu.memory_space<vmem>>, %arg4: memref<4x128xf32, #tpu.memory_space<vmem>>) attributes {dimension_semantics = [#tpu.dimension_semantics<parallel>], iteration_bounds = array<i64: 2>, scalar_prefetch = 0 : i64, scratch_operands = 0 : i64, tpu.core_type = #tpu.core_type<tc>, window_params = [{transform_indices = @transform_0, window_bounds = array<i64: 108, 128>}, {pipeline_mode = #tpu.pipeline_mode<synchronous>, transform_indices = @transform_1, window_bounds = array<i64: 4, 108>}, {pipeline_mode = #tpu.pipeline_mode<synchronous>, transform_indices = @transform_2, window_bounds = array<i64: 4, 1>}, {transform_indices = @transform_3, window_bounds = array<i64: 4, 128>}]} {
    %c0 = arith.constant 0 : index
    %c0_0 = arith.constant 0 : index
    %0 = vector.load %arg2[%c0, %c0_0] : memref<4x108xf32, #tpu.memory_space<vmem>>, vector<4x108xf32>
    %c0_1 = arith.constant 0 : index
    %c0_2 = arith.constant 0 : index
    %1 = vector.load %arg1[%c0_1, %c0_2] : memref<108x128xf32, #tpu.memory_space<vmem>>, vector<108x128xf32>
    %cst = arith.constant dense<0.000000e+00> : vector<4x128xf32>
    %2 = tpu.matmul %0, %1, %cst {dimension_numbers = #tpu.dot_dimension_numbers<[1], [0], [0], [1], [0, 0, 1, 1], [], []>} : vector<4x108xf32>, vector<108x128xf32>, vector<4x128xf32> -> vector<4x128xf32>
    %c0_3 = arith.constant 0 : index
    %c0_4 = arith.constant 0 : index
    %3 = vector.load %arg3[%c0_3, %c0_4] : memref<4x1xf32, #tpu.memory_space<vmem>>, vector<4x1xf32>
    %4 = vector.broadcast %3 : vector<4x1xf32> to vector<4x128xf32>
    %5 = arith.addf %2, %4 : vector<4x128xf32>
    %cst_5 = arith.constant 0.000000e+00 : f32
    %6 = vector.broadcast %cst_5 : f32 to vector<4x128xf32>
    %7 = arith.maximumf %5, %6 : vector<4x128xf32>
    %c0_6 = arith.constant 0 : index
    %c0_7 = arith.constant 0 : index
    %8 = vector.load %arg4[%c0_6, %c0_7] : memref<4x128xf32, #tpu.memory_space<vmem>>, vector<4x128xf32>
    tpu.vector_store %arg4[%c0_6, %c0_7], %7 {strides = array<i32>} : memref<4x128xf32, #tpu.memory_space<vmem>>, vector<4x128xf32>,
    return
  }
  func.func @transform_0(%arg0: i32) -> (i32, i32) {
    %c0_i32 = arith.constant 0 : i32
    %c0_i32_0 = arith.constant 0 : i32
    return %c0_i32, %arg0 : i32, i32
  }
  func.func @transform_1(%arg0: i32) -> (i32, i32) {
    %c0_i32 = arith.constant 0 : i32
    %c0_i32_0 = arith.constant 0 : i32
    %c0_i32_1 = arith.constant 0 : i32
    return %c0_i32, %c0_i32_0 : i32, i32
  }
  func.func @transform_2(%arg0: i32) -> (i32, i32) {
    %c0_i32 = arith.constant 0 : i32
    %c0_i32_0 = arith.constant 0 : i32
    %c0_i32_1 = arith.constant 0 : i32
    return %c0_i32, %c0_i32_0 : i32, i32
  }
  func.func @transform_3(%arg0: i32) -> (i32, i32) {
    %c0_i32 = arith.constant 0 : i32
    %c0_i32_0 = arith.constant 0 : i32
    return %c0_i32, %arg0 : i32, i32
  }
}

module attributes {stable_mosaic.version = 11 : i64} {
  func.func @_dual_matmul_bias_relu_kernel(%arg0: i32, %arg1: memref<4x128xf32, #tpu.memory_space<vmem>>, %arg2: memref<16x4xf32, #tpu.memory_space<vmem>>, %arg3: memref<16x1xf32, #tpu.memory_space<vmem>>, %arg4: memref<8x128xf32, #tpu.memory_space<vmem>>, %arg5: memref<16x8xf32, #tpu.memory_space<vmem>>, %arg6: memref<16x1xf32, #tpu.memory_space<vmem>>, %arg7: memref<16x128xf32, #tpu.memory_space<vmem>>) attributes {dimension_semantics = [#tpu.dimension_semantics<parallel>], iteration_bounds = array<i64: 2>, scalar_prefetch = 0 : i64, scratch_operands = 0 : i64, tpu.core_type = #tpu.core_type<tc>, window_params = [{transform_indices = @transform_0, window_bounds = array<i64: 4, 128>}, {pipeline_mode = #tpu.pipeline_mode<synchronous>, transform_indices = @transform_1, window_bounds = array<i64: 16, 4>}, {pipeline_mode = #tpu.pipeline_mode<synchronous>, transform_indices = @transform_2, window_bounds = array<i64: 16, 1>}, {transform_indices = @transform_3, window_bounds = array<i64: 8, 128>}, {pipeline_mode = #tpu.pipeline_mode<synchronous>, transform_indices = @transform_4, window_bounds = array<i64: 16, 8>}, {pipeline_mode = #tpu.pipeline_mode<synchronous>, transform_indices = @transform_5, window_bounds = array<i64: 16, 1>}, {transform_indices = @transform_6, window_bounds = array<i64: 16, 128>}]} {
    %c0 = arith.constant 0 : index
    %c0_0 = arith.constant 0 : index
    %0 = vector.load %arg2[%c0, %c0_0] : memref<16x4xf32, #tpu.memory_space<vmem>>, vector<16x4xf32>
    %c0_1 = arith.constant 0 : index
    %c0_2 = arith.constant 0 : index
    %1 = vector.load %arg1[%c0_1, %c0_2] : memref<4x128xf32, #tpu.memory_space<vmem>>, vector<4x128xf32>
    %cst = arith.constant dense<0.000000e+00> : vector<16x128xf32>
    %2 = tpu.matmul %0, %1, %cst {dimension_numbers = #tpu.dot_dimension_numbers<[1], [0], [0], [1], [0, 0, 1, 1], [], []>} : vector<16x4xf32>, vector<4x128xf32>, vector<16x128xf32> -> vector<16x128xf32>
    %c0_3 = arith.constant 0 : index
    %c0_4 = arith.constant 0 : index
    %3 = vector.load %arg5[%c0_3, %c0_4] : memref<16x8xf32, #tpu.memory_space<vmem>>, vector<16x8xf32>
    %c0_5 = arith.constant 0 : index
    %c0_6 = arith.constant 0 : index
    %4 = vector.load %arg4[%c0_5, %c0_6] : memref<8x128xf32, #tpu.memory_space<vmem>>, vector<8x128xf32>
    %cst_7 = arith.constant dense<0.000000e+00> : vector<16x128xf32>
    %5 = tpu.matmul %3, %4, %cst_7 {dimension_numbers = #tpu.dot_dimension_numbers<[1], [0], [0], [1], [0, 0, 1, 1], [], []>} : vector<16x8xf32>, vector<8x128xf32>, vector<16x128xf32> -> vector<16x128xf32>
    %c0_8 = arith.constant 0 : index
    %c0_9 = arith.constant 0 : index
    %6 = vector.load %arg3[%c0_8, %c0_9] : memref<16x1xf32, #tpu.memory_space<vmem>>, vector<16x1xf32>
    %7 = vector.broadcast %6 : vector<16x1xf32> to vector<16x128xf32>
    %8 = arith.addf %2, %7 : vector<16x128xf32>
    %9 = arith.addf %8, %5 : vector<16x128xf32>
    %c0_10 = arith.constant 0 : index
    %c0_11 = arith.constant 0 : index
    %10 = vector.load %arg6[%c0_10, %c0_11] : memref<16x1xf32, #tpu.memory_space<vmem>>, vector<16x1xf32>
    %11 = vector.broadcast %10 : vector<16x1xf32> to vector<16x128xf32>
    %12 = arith.addf %9, %11 : vector<16x128xf32>
    %cst_12 = arith.constant 0.000000e+00 : f32
    %13 = vector.broadcast %cst_12 : f32 to vector<16x128xf32>
    %14 = arith.maximumf %12, %13 : vector<16x128xf32>
    %c0_13 = arith.constant 0 : index
    %c0_14 = arith.constant 0 : index
    %15 = vector.load %arg7[%c0_13, %c0_14] : memref<16x128xf32, #tpu.memory_space<vmem>>, vector<16x128xf32>
    tpu.vector_store %arg7[%c0_13, %c0_14], %14 {strides = array<i32>} : memref<16x128xf32, #tpu.memory_space<vmem>>, vector<16x128xf32>,
    return
  }
  func.func @transform_0(%arg0: i32) -> (i32, i32) {
    %c0_i32 = arith.constant 0 : i32
    %c0_i32_0 = arith.constant 0 : i32
    return %c0_i32, %arg0 : i32, i32
  }
  func.func @transform_1(%arg0: i32) -> (i32, i32) {
    %c0_i32 = arith.constant 0 : i32
    %c0_i32_0 = arith.constant 0 : i32
    %c0_i32_1 = arith.constant 0 : i32
    return %c0_i32, %c0_i32_0 : i32, i32
  }
  func.func @transform_2(%arg0: i32) -> (i32, i32) {
    %c0_i32 = arith.constant 0 : i32
    %c0_i32_0 = arith.constant 0 : i32
    %c0_i32_1 = arith.constant 0 : i32
    return %c0_i32, %c0_i32_0 : i32, i32
  }
  func.func @transform_3(%arg0: i32) -> (i32, i32) {
    %c0_i32 = arith.constant 0 : i32
    %c0_i32_0 = arith.constant 0 : i32
    return %c0_i32, %arg0 : i32, i32
  }
  func.func @transform_4(%arg0: i32) -> (i32, i32) {
    %c0_i32 = arith.constant 0 : i32
    %c0_i32_0 = arith.constant 0 : i32
    %c0_i32_1 = arith.constant 0 : i32
    return %c0_i32, %c0_i32_0 : i32, i32
  }
  func.func @transform_5(%arg0: i32) -> (i32, i32) {
    %c0_i32 = arith.constant 0 : i32
    %c0_i32_0 = arith.constant 0 : i32
    %c0_i32_1 = arith.constant 0 : i32
    return %c0_i32, %c0_i32_0 : i32, i32
  }
  func.func @transform_6(%arg0: i32) -> (i32, i32) {
    %c0_i32 = arith.constant 0 : i32
    %c0_i32_0 = arith.constant 0 : i32
    return %c0_i32, %arg0 : i32, i32
  }
}

</mosaic_0001>

<bundles_post_ra>
// kernel: bottleneck3d_forward.3
= control target key start
LH: loop header
LB: loop body
LE: loop exit
PB: predicated region body
PF: predicated region fallthrough
CT: control target
= control target key end

     0   :  { %8 = vsyncpa [#allocation3], 0  ;;  %s659_s0 = inlined_call_operand.vmem [shape: f32[8,2048], index: 0, kind: input, shape index: {}]   ;;  %s660_s1 = inlined_call_operand.hbm [shape: f32[4,8], index: 1, kind: input, shape index: {}]   ;;  %s661_s2 = inlined_call_operand.hbm [shape: f32[4,1], index: 2, kind: input, shape index: {}]   ;;  %s662_s3 = inlined_call_operand.vmem [shape: f32[4,2048], index: 3, kind: output, shape index: {}]  }
   0x1   :  { %9 = vsyncpa [#allocation5], 0  ;;  %s590_s12 = smov 0  }
   0x2 LB: > { %s449_s13 = sadd.s32 4294967295, %s564_s12   ;;  %p451_p0 = scmp.ge.s32.totalorder %s564_s12, 1  ;;  %s564_s12 = sphi %s590_s12, %s15_s12  }
   0x3   : > { %p114_p1 = scmp.lt.s32.totalorder %s564_s12, 5  ;;  %p600_p2 = scmp.eq.s32.totalorder %s449_s13, 0 }
   0x4   : > { %s566_s16 = smov [#allocation2]   ;;  %s567_s18 = smov [#allocation4]  }
   0x5   : > { %s666_s14 = scalar_select %p600_p2, 1, 0 }
   0x6   : > { %p604_p3 = pnand %p451_p0, %p114_p1  ;;  %s127_s17 = sshll.u32 %s566_s16, 4  ;;  %s128_s17 = int_to_ptr.vmem [resolvable:$true] %s127_s17 }
   0x7   : > { %s138_s19 = sshll.u32 %s567_s18, 4  ;;  %s509_s21 = scalar_lea.vmem %s128_s17, 64  ;;  %s139_s19 = int_to_ptr.vmem [resolvable:$true] %s138_s19 }
   0x8   : > { %s667_s15 = scalar_select %p604_p3, 1, 0 }
   0x9   : > { %p474_p4 = pneg %p604_p3  ;;  %p510_p7 = scmp.ne.s32.totalorder %s128_s17, %s509_s21 }
   0xa   : > { %p517_p10 = scmp.lt.s32.totalorder %s128_s17, %s128_s17  ;;  %p518_p11 = scmp.lt.s32.totalorder %s509_s21, %s509_s21 }
   0xb   : > { %p612_p5 = pnand %p600_p2, %p474_p4 }
   0xc   : > { %p519_p12 = por %p518_p11, %p517_p10 }
   0xd   : > { %p500_p6 = pneg %p612_p5 }
   0xf   : > { %p512_p8 = pnand %p510_p7, %p500_p6 }
  0x11   : > { %p513_p9 = pneg %p512_p8 }
  0x13   : > { %p520_p13 = pnand %p519_p12, %p513_p9 }
  0x15   : > { %523 = shalt.err (!%p520_p13)
}
  0x16   : > { %477 = dma.hbm_to_vmem [thread:$0]  (!%p612_p5), %s660_s1, 64, %s128_s17, [#allocation3]  }
  0x17   : > { %s535_s24 = scalar_lea.vmem %s139_s19, 64  ;;  %p543_p7 = scmp.lt.s32.totalorder %s139_s19, %s139_s19 }
  0x18   : > { %p536_p0 = scmp.ne.s32.totalorder %s139_s19, %s535_s24  ;;  %p544_p8 = scmp.lt.s32.totalorder %s535_s24, %s535_s24 }
  0x1a   : > { %p538_p1 = pnand %p536_p0, %p500_p6  ;;  %p545_p2 = por %p544_p8, %p543_p7 }
  0x1c   : > { %p539_p4 = pneg %p538_p1 }
  0x1e   : > { %p546_p3 = pnand %p545_p2, %p539_p4 }
  0x20   : > { %549 = shalt.err (!%p546_p3)
}
  0x21   : > { %480 = dma.hbm_to_vmem [thread:$0]  (!%p612_p5), %s661_s2, 64, %s139_s19, [#allocation5]  }
  0x22   : > { %p669_p9 = scmp.ne.s32.totalorder %s667_s15, 0 }
  0x23   : > { %p670_p10 = scmp.ne.s32.totalorder (!%p669_p9), %s666_s14, 0 }
  0x24   : > { %160 = sbr.rel (%p669_p9) target bundleno = 255 (0xff), region = 32 }
  0x29   : > { %555 = dma.done.wait (%p670_p10), [#allocation3], 64  }
  0x2a   : > { %557 = vsyncadd (%p670_p10), [#allocation3], 4294967232 }
  0x2b   : > { %559 = dma.done.wait (%p670_p10), [#allocation5], 64  }
  0x2c   : > { %561 = vsyncadd (%p670_p10), [#allocation5], 4294967232  ;;  %s458_s27 = sshll.u32 %s449_s13, 2  ;;  %v568_v0 = vmov 0.0   ;;  %v569_v1 = vmov 0   ;;  %vm211_vm0 = vcmask 64512  }
  0x2d   : > { %p189_p2 = scmp.lt.s32.totalorder %s458_s27, 15  ;;  %279 = vmatprep.mubr.f32.mxu0 %v568_v0  ;;  %350 = vmatprep.mubr.f32.mxu1 %v568_v0  ;;  %v200_v6 = vld [vmem:[#allocation2] sm:$0xf]  ;;  %v205_v7 = vld [vmem:[#allocation4] sm:$0xf] }
  0x2e   : > { %497 = vset.pattern.permute.xlu0 %v569_v1 }
  0x2f   : > { %s672_s27 = smov (!%p189_p2, %s458_s27), 15  ;;  %208 = vperm.xlu0 %497, %v205_v7  }
  0x30   : > { %s459_s28 = sshll.u32 %s672_s27, 3  ;;  %s461_s5 = sshll.u32 %s672_s27, 2 }
  0x31   : > { %s192_s4 = scalar_lea.vmem %s659_s0, %s459_s28  ;;  %s198_s8 = scalar_lea.vmem %s662_s3, %s461_s5 }
  0x32   : > { %v202_v2 = vld [vmem:[%s192_s4 + $0x8] sm:$0xff]  ;;  %v204_v3 = vld [vmem:[%s192_s4 + $0x18] sm:$0xff]  ;;  %v201_v4 = vld [vmem:[%s192_s4] sm:$0xff] }
  0x33   : > { %245 = vmatprep.subr.mxu0 %v202_v2  ;;  %316 = vmatprep.subr.mxu1 %v204_v3  ;;  %v203_v5 = vld [vmem:[%s192_s4 + $0x10] sm:$0xff] }
  0x34   : > { %246 = vmatpush1.msra.mxu0 %v201_v4  ;;  %317 = vmatpush1.msra.mxu1 %v203_v5 }
  0x35   : > { %462 = vmatmul.mubr.msk.f32.vlgmr.msra.gmra.mxu0 %vm211_vm0, %v200_v6  ;;  %463 = vmatmul.mubr.msk.f32.vlgmr.msra.gmra.mxu1 %vm211_vm0, %v200_v6 }
  0xaa   : > { %v209_v8 = vpop.permute.xlu0 %208 }
  0xf5   : > { %v281_v9 = vpop.f32.mrf.mxu0  ;;  %v352_v10 = vpop.f32.mrf.mxu1 }
  0xf6   : > { %v282_v11 = vadd.f32 %v281_v9, %v209_v8  ;;  %v353_v12 = vadd.f32 %v352_v10, %v209_v8 }
  0xf7   : > { %v283_v13 = vpop.f32.mrf.mxu0  ;;  %v354_v14 = vpop.f32.mrf.mxu1 }
  0xf8   : > { %v284_v15 = vadd.f32 %v283_v13, %v209_v8  ;;  %v355_v16 = vadd.f32 %v354_v14, %v209_v8  ;;  %v357_v17 = vmax.f32 %v282_v11, 0.0  ;;  %v359_v18 = vmax.f32 %v353_v12, 0.0 }
  0xfa   : > { %v358_v19 = vmax.f32 %v284_v15, 0.0  ;;  %v360_v20 = vmax.f32 %v355_v16, 0.0 }
  0xfc   : > { %v365_v21 = vcombine.low %v357_v17, %v358_v19  ;;  %v366_v22 = vcombine.low %v359_v18, %v360_v20 }
  0xfe   : > { %369 = vst [vmem:[%s198_s8] sm:$0xff] %v365_v21  ;;  %370 = vst [vmem:[%s198_s8 + $0x8] sm:$0xff] %v366_v22 }
  0xff PF: > { %s15_s12 = sadd.s32 1, %s564_s12  }
 0x100   : > { %p12_p3 = scmp.ge.s32.totalorder %s15_s12, 6  }
 0x102   :  { %14 = sbr.rel (!%p12_p3) target bundleno = 2 (0x2), region = 71 }
 0x107   :  { %393 = vsyncpa [#allocation3], 1 }
 0x108   :  { %395 = vsyncpa [#allocation3 + $0x1], 1 }
 0x109   :  { %396 = vsyncpa [#allocation5], 1 }

// kernel: bottleneck3d_forward.4
= control target key start
LH: loop header
LB: loop body
LE: loop exit
PB: predicated region body
PF: predicated region fallthrough
CT: control target
= control target key end

     0   :  { %s550_s12 = smov 0   ;;  %s552_s13 = smov 0   ;;  %s626_s0 = inlined_call_operand.vmem [shape: f32[108,256], index: 0, kind: input, shape index: {}]   ;;  %s627_s1 = inlined_call_operand.vmem [shape: f32[4,108], index: 1, kind: input, shape index: {}]   ;;  %s628_s2 = inlined_call_operand.vmem [shape: f32[4,1], index: 2, kind: input, shape index: {}]   ;;  %s629_s3 = inlined_call_operand.vmem [shape: f32[4,256], index: 3, kind: output, shape index: {}]  }
   0x1   :  { %s554_s14 = smov 0  }
   0x2 LB: > { %s416_s15 = sadd.s32 4294967295, %s525_s14   ;;  %s567_s16 = sadd.s32 1, %s525_s14   ;;  %s525_s14 = sphi %s554_s14, %s632_s14   ;;  %s521_s13 = sphi %s552_s13, %s631_s13   ;;  %s517_s12 = sphi %s550_s12, %s630_s12  }
   0x3   : > { %s17_s17 = ssub.s32 %s525_s14, %s567_s16  ;;  %s20_s18 = sadd.s32 1, %s521_s13 }
   0x4   : > { %p18_p0 = scmp.eq.s32.totalorder %s17_s17, 0  ;;  %p27_p1 = scmp.ne.s32.totalorder %s521_s13, %s517_s12 }
   0x5   : > { %p28_p2 = scmp.eq.s32.totalorder %s525_s14, 0  ;;  %p419_p4 = scmp.ge.s32.totalorder %s525_s14, 2 }
   0x6   : > { %s576_s19 = scalar_select %p18_p0, %s521_s13, %s20_s18  }
   0x7   : > { %p29_p3 = por %p28_p2, %p27_p1  ;;  %127 = sbr.rel (%p419_p4) target bundleno = 23 (0x17), region = 24 }
   0xc   : > { %130 = sbr.rel (!%p29_p3) target bundleno = 23 (0x17), region = 28  ;;  %s132_s20 = sand.u32 (%p29_p3), 1, %s521_s13  }
   0xd   : > { %s420_s21 = sshll.u32 (%p29_p3), %s525_s14, 3  ;;  %s473_s22 = smul.u32 (%p29_p3), 112, %s132_s20 }
   0xe   : > { %s136_s25 = scalar_lea.vmem (%p29_p3), %s626_s0, %s420_s21 }
   0xf   : > { %v191_v0 = vld [vmem:[%s136_s25] sm:$0xff] (%p29_p3)  ;;  %v193_v1 = vld [vmem:[%s136_s25 + $0x10] sm:$0xff] (%p29_p3)  ;;  %s134_s26 = scalar_lea.vmem (%p29_p3), [#allocation2], %s473_s22 }
  0x10   : > { %v195_v2 = vld [vmem:[%s136_s25 + $0x20] sm:$0xff] (%p29_p3)  ;;  %v197_v3 = vld [vmem:[%s136_s25 + $0x30] sm:$0xff] (%p29_p3)  ;;  %192 = vst [vmem:[%s134_s26] sm:$0xff] (%p29_p3), %v191_v0  ;;  %194 = vst [vmem:[%s134_s26 + $0x8] sm:$0xff] (%p29_p3), %v193_v1 }
  0x11   : > { %v199_v4 = vld [vmem:[%s136_s25 + $0x40] sm:$0xff]  ;;  %v201_v5 = vld [vmem:[%s136_s25 + $0x50] sm:$0xff]  ;;  %196 = vst [vmem:[%s134_s26 + $0x10] sm:$0xff] %v195_v2  ;;  %198 = vst [vmem:[%s134_s26 + $0x18] sm:$0xff] %v197_v3 }
  0x12   : > { %200 = vst [vmem:[%s134_s26 + $0x20] sm:$0xff] %v199_v4  ;;  %202 = vst [vmem:[%s134_s26 + $0x28] sm:$0xff] %v201_v5  ;;  %v203_v6 = vld [vmem:[%s136_s25 + $0x60] sm:$0xff]  ;;  %v205_v7 = vld [vmem:[%s136_s25 + $0x70] sm:$0xff] }
  0x13   : > { %v207_v8 = vld [vmem:[%s136_s25 + $0x80] sm:$0xff]  ;;  %204 = vst [vmem:[%s134_s26 + $0x30] sm:$0xff] %v203_v6  ;;  %206 = vst [vmem:[%s134_s26 + $0x38] sm:$0xff] %v205_v7  ;;  %v209_v9 = vld [vmem:[%s136_s25 + $0x90] sm:$0xff] }
  0x14   : > { %208 = vst [vmem:[%s134_s26 + $0x40] sm:$0xff] %v207_v8  ;;  %v211_v10 = vld [vmem:[%s136_s25 + $0xa0] sm:$0xff]  ;;  %v213_v11 = vld [vmem:[%s136_s25 + $0xb0] sm:$0xff]  ;;  %210 = vst [vmem:[%s134_s26 + $0x48] sm:$0xff] %v209_v9 }
  0x15   : > { %212 = vst [vmem:[%s134_s26 + $0x50] sm:$0xff] %v211_v10  ;;  %214 = vst [vmem:[%s134_s26 + $0x58] sm:$0xff] %v213_v11  ;;  %v215_v12 = vld [vmem:[%s136_s25 + $0xc0] sm:$0xff]  ;;  %v217_v13 = vld [vmem:[%s136_s25 + $0xd0] sm:$0xff] }
  0x16   : > { %216 = vst [vmem:[%s134_s26 + $0x60] sm:$0xff] %v215_v12  ;;  %218 = vst [vmem:[%s134_s26 + $0x68] sm:$0xff] %v217_v13 }
  0x17 PF: > { %p421_p5 = scmp.ge.s32.totalorder %s525_s14, 1  ;;  %p223_p6 = scmp.lt.s32.totalorder %s525_s14, 3 }
  0x19   : > { %p224_p7 = pnand %p421_p5, %p223_p6 }
  0x1a   : > { %s230_s27 = sand.u32 (!%p224_p7), 1, %s517_s12   ;;  %p252_p8 = scmp.lt.s32.totalorder (!%p224_p7), %s416_s15, 1 }
  0x1b   : > { %227 = sbr.rel (%p224_p7) target bundleno = 259 (0x103), region = 66 }
  0x1c   : > { %s474_s28 = smul.u32 (!%p224_p7), 112, %s230_s27 }
  0x1e   : > { %s590_s4 = scalar_lea.vmem (!%p224_p7), [#allocation2], %s474_s28 }
  0x20   : > { %v527_v14 = vmov 0.0   ;;  %vm528_vm0 = vmmov 0   ;;  %v271_v15 = vld [vmem:[%s628_s2] sm:$0xf]  ;;  %vm281_vm1 = vcmask 1043456   ;;  %v529_v16 = vmov 0  }
  0x21   : > { %442 = vmatprep.subr.mxu0 %v527_v14  ;;  %470 = vmatprep.mubr.msk.f32.mxu0 %vm528_vm0, %v527_v14  ;;  %v270_v17 = vld [vmem:[%s590_s4 + $0x68] sm:$0xf]  ;;  %v269_v18 = vld [vmem:[%s590_s4 + $0x60] sm:$0xff]  ;;  %v268_v19 = vld [vmem:[%s590_s4 + $0x58] sm:$0xff]  ;;  %vm277_vm2 = vcmask 883712   ;;  %s634_s15 = smov (!%p252_p8, %s416_s15), 1 }
  0x22   : > { %502 = vset.pattern.permute.xlu0 %v529_v16  ;;  %443 = vmatpush3.msk.msra.mxu0 %vm281_vm1, %v270_v17  ;;  %v267_v20 = vld [vmem:[%s590_s4 + $0x50] sm:$0xff]  ;;  %v266_v21 = vld [vmem:[%s590_s4 + $0x48] sm:$0xff]  ;;  %v265_v22 = vld [vmem:[%s590_s4 + $0x40] sm:$0xff]  ;;  %s422_s7 = sshll.u32 %s634_s15, 2 }
  0x23   : > { %274 = vperm.xlu0 %502, %v271_v15   ;;  %444 = vmatprep.subr.mxu0 %v527_v14  ;;  %v264_v23 = vld [vmem:[%s590_s4 + $0x38] sm:$0xff]  ;;  %v263_v24 = vld [vmem:[%s590_s4 + $0x30] sm:$0xff]  ;;  %v262_v25 = vld [vmem:[%s590_s4 + $0x28] sm:$0xff]  ;;  %s255_s10 = scalar_lea.vmem %s629_s3, %s422_s7 }
  0x24   : > { %445 = vmatpush3.msra.mxu0 %v269_v18  ;;  %v261_v26 = vld [vmem:[%s590_s4 + $0x20] sm:$0xff]  ;;  %v260_v27 = vld [vmem:[%s590_s4 + $0x18] sm:$0xff]  ;;  %v259_v28 = vld [vmem:[%s590_s4 + $0x10] sm:$0xff] }
  0x25   : > { %446 = vmatprep.subr.mxu0 %v527_v14  ;;  %v258_v29 = vld [vmem:[%s590_s4 + $0x8] sm:$0xff]  ;;  %v257_v30 = vld [vmem:[%s590_s4] sm:$0xff] }
  0x26   : > { %447 = vmatpush3.msra.mxu0 %v268_v19  ;;  %v256_v31 = vld [vmem:[%s627_s1] sm:$0xf] }
  0x27   : > { %448 = vmatprep.subr.mxu0 %v527_v14 }
  0x28   : > { %449 = vmatpush3.msra.mxu0 %v267_v20 }
  0x29   : > { %450 = vmatprep.subr.mxu0 %v527_v14 }
  0x2a   : > { %451 = vmatpush3.msra.mxu0 %v266_v21 }
  0x2b   : > { %452 = vmatprep.subr.mxu0 %v527_v14 }
  0x2c   : > { %453 = vmatpush3.msra.mxu0 %v265_v22 }
  0x2d   : > { %454 = vmatprep.subr.mxu0 %v527_v14 }
  0x2e   : > { %455 = vmatpush3.msra.mxu0 %v264_v23 }
  0x2f   : > { %456 = vmatprep.subr.mxu0 %v527_v14 }
  0x30   : > { %457 = vmatpush3.msra.mxu0 %v263_v24 }
  0x31   : > { %458 = vmatprep.subr.mxu0 %v527_v14 }
  0x32   : > { %459 = vmatpush3.msra.mxu0 %v262_v25 }
  0x33   : > { %460 = vmatprep.subr.mxu0 %v527_v14 }
  0x34   : > { %461 = vmatpush3.msra.mxu0 %v261_v26 }
  0x35   : > { %462 = vmatprep.subr.mxu0 %v527_v14 }
  0x36   : > { %463 = vmatpush3.msra.mxu0 %v260_v27 }
  0x37   : > { %464 = vmatprep.subr.mxu0 %v527_v14 }
  0x38   : > { %465 = vmatpush3.msra.mxu0 %v259_v28 }
  0x39   : > { %466 = vmatprep.subr.mxu0 %v527_v14 }
  0x3a   : > { %467 = vmatpush3.msra.mxu0 %v258_v29 }
  0x3b   : > { %468 = vmatprep.subr.mxu0 %v527_v14 }
  0x3c   : > { %469 = vmatpush3.msra.mxu0 %v257_v30 }
  0x3d   : > { %471 = vmatmul.mubr.msk.f32.vlgmr.msra.gmra.mxu0 %vm277_vm2, %v256_v31 }
  0x9e   : > { %v275_v32 = vpop.permute.xlu0 %274 }
  0xfd   : > { %v351_v33 = vpop.f32.mrf.mxu0 }
  0xfe   : > { %v352_v34 = vadd.f32 %v351_v33, %v275_v32 }
  0xff   : > { %v472_v35 = vpop.f32.mrf.mxu0 }
 0x100   : > { %v355_v36 = vmax.f32 %v352_v34, 0.0 }
 0x102   : > { %356 = vst [vmem:[%s255_s10] sm:$0xf] %v355_v36 }
 0x103 PF: > { %p10_p9 = scmp.ge.s32.totalorder %s567_s16, 4   ;;  %s630_s12 = smov %s521_s13 }
 0x104   : > { %s631_s13 = smov %s576_s19  ;;  %s632_s14 = smov %s567_s16 }
 0x105   :  { %12 = sbr.rel (!%p10_p9) target bundleno = 2 (0x2), region = 105 }

// kernel: bottleneck3d_forward.5
= control target key start
LH: loop header
LB: loop body
LE: loop exit
PB: predicated region body
PF: predicated region fallthrough
CT: control target
= control target key end

     0   :  { %s694_s21 = smov 0   ;;  %s696_s22 = smov 0   ;;  %s776_s0 = inlined_call_operand.vmem [shape: f32[4,256], index: 0, kind: input, shape index: {}]   ;;  %s777_s1 = inlined_call_operand.vmem [shape: f32[16,4], index: 1, kind: input, shape index: {}]   ;;  %s778_s2 = inlined_call_operand.vmem [shape: f32[16,1], index: 2, kind: input, shape index: {}]   ;;  %s779_s3 = inlined_call_operand.vmem [shape: f32[8,256], index: 3, kind: input, shape index: {}]   ;;  %s780_s4 = inlined_call_operand.vmem [shape: f32[16,8], index: 4, kind: input, shape index: {}]   ;;  %s781_s5 = inlined_call_operand.vmem [shape: f32[16,1], index: 5, kind: input, shape index: {}]   ;;  %s782_s6 = inlined_call_operand.vmem [shape: f32[16,256], index: 6, kind: output, shape index: {}]  }
   0x1   :  { %s698_s23 = smov 0  }
   0x2 LB: > { %s707_s24 = sadd.s32 4294967295, %s656_s23   ;;  %s709_s25 = sadd.s32 1, %s656_s23   ;;  %s656_s23 = sphi %s698_s23, %s786_s23   ;;  %s652_s22 = sphi %s696_s22, %s785_s22   ;;  %s648_s21 = sphi %s694_s21, %s784_s21  }
   0x3   : > { %s156_s26 = ssub.s32 %s656_s23, %s709_s25  ;;  %s159_s27 = sadd.s32 1, %s652_s22 }
   0x4   : > { %p157_p0 = scmp.eq.s32.totalorder %s156_s26, 0  ;;  %p169_p1 = scmp.ne.s32.totalorder %s652_s22, %s648_s21 }
   0x5   : > { %p170_p2 = scmp.eq.s32.totalorder %s707_s24, 1  ;;  %p578_p3 = scmp.ge.s32.totalorder %s656_s23, 1 }
   0x6   : > { %s717_s28 = scalar_select %p157_p0, %s652_s22, %s159_s27  }
   0x7   : > { %p719_p4 = por %p170_p2, %p169_p1  ;;  %p220_p5 = scmp.lt.s32.totalorder %s656_s23, 3 }
   0x9   : > { %p221_p6 = pnand %p578_p3, %p220_p5 }
   0xa   : > { %p252_p7 = scmp.lt.s32.totalorder (!%p221_p6), %s707_s24, 1  ;;  %s249_s13 = sand.u32 (!%p221_p6), 1, %s648_s21  }
   0xb   : > { %224 = sbr.rel (%p221_p6) target bundleno = 236 (0xec), region = 44  ;;  %s579_s14 = sshll.u32 (!%p221_p6), %s249_s13, 4 }
  0x10   : > { %v263_v0 = vld [vmem:[%s780_s4] sm:$0xff]  ;;  %vm266_vm0 = vcmask 64512   ;;  %vm360_vm1 = vcmask 31744   ;;  %s253_s12 = scalar_select %p252_p7, %s707_s24, 1  ;;  %v658_v3 = vmov 0   ;;  %vm367_vm2 = vcmask 1043456  }
  0x11   : > { %v260_v1 = vld [vmem:[%s777_s1] sm:$0xff]  ;;  %599 = vmatprep.mubr.msk.f32.mxu0 %vm266_vm0, %v263_v0  ;;  %632 = vset.pattern.permute.xlu0 %v658_v3  ;;  %v264_v5 = vld [vmem:[%s780_s4 + $0x8] sm:$0xff]  ;;  %s588_s21 = sshll.u32 (%p719_p4), %s707_s24, 3 }
  0x12   : > { %604 = vmatprep.mubr.msk.f32.mxu1 %vm360_vm1, %v260_v1  ;;  %v348_v2 = vld [vmem:[%s778_s2] sm:$0xff]  ;;  %633 = vset.pattern.permute.xlu1 %v658_v3  ;;  %s581_s15 = sshll.u32 %s253_s12, 3  ;;  %s580_s16 = sshll.u32 %s253_s12, 2  ;;  %v261_v8 = vld [vmem:[%s777_s1 + $0x8] sm:$0xff] }
  0x13   : > { %v448_v4 = vld [vmem:[%s781_s5] sm:$0xff]  ;;  %352 = vperm.xlu0 %632, %v348_v2   ;;  %s259_s19 = scalar_lea.vmem %s779_s3, %s581_s15  ;;  %s255_s26 = scalar_lea.vmem %s776_s0, %s580_s16  ;;  %v349_v9 = vld [vmem:[%s778_s2 + $0x8] sm:$0xff] }
  0x14   : > { %452 = vperm.xlu1 %633, %v448_v4   ;;  %v265_v6 = vld [vmem:[%s259_s19] sm:$0xff]  ;;  %v449_v10 = vld [vmem:[%s781_s5 + $0x8] sm:$0xff]  ;;  %s251_s15 = scalar_lea.vmem [#allocation2], %s579_s14  ;;  %s474_s18 = scalar_lea.vmem (%p719_p4), %s782_s6, %s588_s21 }
  0x15   : > { %v262_v7 = vld [vmem:[%s255_s26] sm:$0xf]  ;;  %597 = vmatprep.subr.mxu0 %v265_v6 }
  0x16   : > { %602 = vmatprep.subr.msk.mxu1 %vm367_vm2, %v262_v7  ;;  %598 = vmatpush3.msra.mxu0 %v265_v6 }
  0x17   : > { %603 = vmatpush3.msk.msra.mxu1 %vm367_vm2, %v262_v7  ;;  %600 = vmatmul.mubr.msk.f32.vlgmr.msra.gmra.mxu0 %vm266_vm0, %v264_v5 }
  0x18   : > { %605 = vmatmul.mubr.msk.f32.vlgmr.msra.gmra.mxu1 %vm360_vm1, %v261_v8  ;;  %357 = vperm.xlu0 %632, %v349_v9  }
  0x19   : > { %457 = vperm.xlu1 %633, %v449_v10  }
  0x8e   : > { %v353_v11 = vpop.permute.xlu0 %352 }
  0x8f   : > { %v453_v12 = vpop.permute.xlu1 %452 }
  0x93   : > { %v358_v13 = vpop.permute.xlu0 %357 }
  0x94   : > { %v458_v20 = vpop.permute.xlu1 %457 }
  0xd7   : > { %v601_v14 = vpop.f32.mrf.mxu0 }
  0xd8   : > { %v606_v15 = vpop.f32.mrf.mxu1 }
  0xd9   : > { %v443_v16 = vadd.f32 %v606_v15, %v358_v13  ;;  %v339_v21 = vpop.f32.mrf.mxu0 }
  0xda   : > { %v437_v17 = vpop.f32.mrf.mxu1 }
  0xdb   : > { %v447_v18 = vadd.f32 %v601_v14, %v443_v16  ;;  %v438_v19 = vadd.f32 %v437_v17, %v353_v11 }
  0xdd   : > { %v461_v22 = vadd.f32 %v458_v20, %v447_v18  ;;  %v446_v23 = vadd.f32 %v438_v19, %v339_v21 }
  0xdf   : > { %v463_v24 = vmax.f32 %v461_v22, 0.0  ;;  %v460_v25 = vadd.f32 %v453_v12, %v446_v23  ;;  %472 = sbr.rel (!%p719_p4) target bundleno = 236 (0xec), region = 48 }
  0xe1   : > { %465 = vst [vmem:[%s251_s15 + $0x8] sm:$0xff] %v463_v24  ;;  %v462_v26 = vmax.f32 %v460_v25, 0.0 }
  0xe3   : > { %464 = vst [vmem:[%s251_s15] sm:$0xff] %v462_v26 }
  0xe8   : > { %v507_v28 = vld [vmem:[%s251_s15 + $0x8] sm:$0xff] }
  0xe9   : > { %508 = vst [vmem:[%s474_s18 + $0x10] sm:$0xff] %v507_v28 }
  0xea   : > { %v505_v27 = vld [vmem:[%s251_s15] sm:$0xff] }
  0xeb   : > { %506 = vst [vmem:[%s474_s18] sm:$0xff] %v505_v27 }
  0xec PF: > { %p13_p8 = scmp.ge.s32.totalorder %s709_s25, 4   ;;  %s784_s21 = smov %s652_s22 }
  0xed   : > { %s785_s22 = smov %s717_s28  ;;  %s786_s23 = smov %s709_s25 }
  0xee   :  { %15 = sbr.rel (!%p13_p8) target bundleno = 2 (0x2), region = 115 }

</bundles_post_ra>
